<compile_context>
chip_gen: v5e
topology: v5e:2x2
jax: 0.10.0
libtpu: 0.0.40
codegen_flags: <defaults>
</compile_context>

<pallas_src>
import numpy as np
import jax
import jax.numpy as jnp
from jax import lax
from jax.experimental import pallas as pl
from jax.experimental.pallas import tpu as pltpu

MID = 2        # mid_depth
H0 = 128       # spatial size after AdaptiveAvgPool2d((128, 128))
HP = 64        # spatial size after MaxPool2d(2, 2)
FCSIZE = 200
FCPAD = 256    # FC hidden size padded to a lane-dense multiple of 128


# -----------------------------------------------------------------------------
# Deterministic synthetic parameters (shapes match the torch module __init__).
# -----------------------------------------------------------------------------
def init_params(key):
    conv_shapes = [(MID, 3, 7)] + [(MID, MID, 3)] * 12 + [(1, MID, 3)]
    keys = jax.random.split(key, 2 * len(conv_shapes) + 4)
    ki = 0
    conv_params = []
    for (co, ci, k) in conv_shapes:
        fan_in = ci * k * k
        bound = 1.0 / np.sqrt(fan_in)
        w = jax.random.uniform(keys[ki], (co, ci, k, k), jnp.float32, -bound, bound)
        b = jax.random.uniform(keys[ki + 1], (co,), jnp.float32, -bound, bound)
        ki += 2
        conv_params.append((w, b))

    def linear(kw, kb, fin, fout):
        bound = 1.0 / np.sqrt(fin)
        w = jax.random.uniform(kw, (fout, fin), jnp.float32, -bound, bound)
        b = jax.random.uniform(kb, (fout,), jnp.float32, -bound, bound)
        return w, b

    fc1 = linear(keys[ki], keys[ki + 1], HP * HP, FCSIZE)
    fc3 = linear(keys[ki + 2], keys[ki + 3], FCSIZE, HP * HP)
    # NOTE: the torch module also creates fc2, but forward() never uses it.
    return conv_params, fc1, fc3


# -----------------------------------------------------------------------------
# pltpu.roll direction probe: +1 if pltpu.roll follows the jnp.roll convention
# on this backend, -1 otherwise.  Falls back to the TPU interpreter when no
# TPU device is present in the process (review correctness concern).
# -----------------------------------------------------------------------------
_ROLL_SIGN_CACHE = None


def _roll_probe_kernel(x_ref, o_ref):
    o_ref[...] = pltpu.roll(x_ref[...], 1, axis=1)


def _roll_sign():
    global _ROLL_SIGN_CACHE
    if _ROLL_SIGN_CACHE is not None:
        return _ROLL_SIGN_CACHE
    x = jnp.arange(8 * 128, dtype=jnp.float32).reshape(8, 128)
    call = pl.pallas_call(_roll_probe_kernel,
                          out_shape=jax.ShapeDtypeStruct((8, 128), jnp.float32))
    if jax.default_backend() == "tpu":
        got = call(x)
    else:
        with pltpu.force_tpu_interpret_mode():
            got = call(x)
    _ROLL_SIGN_CACHE = 1 if bool(jnp.array_equal(got, jnp.roll(x, 1, axis=1))) else -1
    return _ROLL_SIGN_CACHE


# -----------------------------------------------------------------------------
# One-time parameter preparation: fold every conv into MXU-friendly banded
# matrices (vertical taps + zero padding + output-channel mixing), build the
# pooling selection matrices, lane masks, bias columns and padded FC weights.
# -----------------------------------------------------------------------------
def _banded(w, h, pad):
    """w: (c_out, c_in, k, k) -> B: (k, c_out*h, c_in*h).

    B[kw, co*h + r, ci*h + rr] = w[co, ci, kh, kw] for rr = r + kh - pad in
    [0, h); out-of-range rows are omitted, which implements the conv's
    vertical zero padding.  The horizontal tap kw is handled in-kernel by a
    lane shift of the matmul result.
    """
    c_out, c_in, k, _ = w.shape
    B = np.zeros((k, c_out * h, c_in * h), np.float32)
    r = np.arange(h)
    for kw in range(k):
        for co in range(c_out):
            for ci in range(c_in):
                for kh in range(k):
                    rr = r + kh - pad
                    ok = (rr >= 0) & (rr < h)
                    B[kw, co * h + r[ok], ci * h + rr[ok]] = w[co, ci, kh, kw]
    return B


def _bias_col(b, h):
    c_out = b.shape[0]
    col = np.zeros((c_out * h, 1), np.float32)
    for co in range(c_out):
        col[co * h:(co + 1) * h, 0] = b[co]
    return col


def prepare_params(conv_params, fc1, fc3):
    conv_np = [(np.asarray(w, np.float32), np.asarray(b, np.float32))
               for (w, b) in conv_params]

    # Stage 1 (per image, 128x128, 128 lanes).
    b1m = _banded(conv_np[0][0], H0, 3)            # (7, 256, 384)
    b2m = _banded(conv_np[1][0], H0, 1)            # (3, 256, 256)
    bias1 = _bias_col(conv_np[0][1], H0)           # (256, 1)
    bias2 = _bias_col(conv_np[1][1], H0)           # (256, 1)

    # Stage 2 (conv3..conv14, channel-stacked 128 rows, 2 images packed in lanes).
    bs2 = np.zeros((12, 3, 2 * HP, 2 * HP), np.float32)
    biases2 = np.zeros((12, 2 * HP, 1), np.float32)
    for idx in range(12):
        w, b = conv_np[2 + idx]
        Bl = _banded(w, HP, 1)                     # (3, c_out*64, 128)
        bs2[idx, :, :Bl.shape[1], :] = Bl
        bc = _bias_col(b, HP)
        biases2[idx, :bc.shape[0], :] = bc

    # Fused 2x2 max-pool row/column selection (+ lane packing) matrices.
    rowsel = np.zeros((2 * HP, 2 * H0), np.float32)
    for co in range(2):
        rowsel[co * HP + np.arange(HP), co * H0 + 2 * np.arange(HP)] = 1.0
    colsel = np.zeros((2, 2 * HP, 2 * HP), np.float32)
    for b in range(2):
        colsel[b, 2 * np.arange(HP), b * HP + np.arange(HP)] = 1.0

    # Lane masks for the post-matmul horizontal shifts.
    # rows 0..2: seg=128 shifts +1,+2,+3 ; rows 3..5: seg=128 shifts -1,-2,-3 ;
    # row 6: seg=64 shift +1 ; row 7: seg=64 shift -1.
    j = np.arange(2 * HP)
    masks = np.zeros((8, 2 * HP), np.float32)
    for s in (1, 2, 3):
        masks[s - 1] = (j >= s)
        masks[2 + s] = (j < 2 * HP - s)
    masks[6] = (j % HP) >= 1
    masks[7] = (j % HP) < HP - 1

    # FC branch (hidden padded 200 -> 256, weights stored bf16).
    (w1, b1), (w3, b3) = fc1, fc3
    w1 = np.asarray(w1, np.float32); b1v = np.asarray(b1, np.float32)
    w3 = np.asarray(w3, np.float32); b3v = np.asarray(b3, np.float32)
    w1t = np.zeros((HP * HP, FCPAD), np.float32); w1t[:, :FCSIZE] = w1.T
    b1p = np.zeros((1, FCPAD), np.float32); b1p[0, :FCSIZE] = b1v
    w3t = np.zeros((FCPAD, HP * HP), np.float32); w3t[:FCSIZE, :] = w3.T
    b3p = b3v.reshape(1, -1)

    bf = jnp.bfloat16
    return {
        "roll_sign": _roll_sign(),
        "b1m": jnp.asarray(b1m, bf), "bias1": jnp.asarray(bias1),
        "b2m": jnp.asarray(b2m, bf), "bias2": jnp.asarray(bias2),
        "bs2": jnp.asarray(bs2, bf), "biases2": jnp.asarray(biases2),
        "rowsel": jnp.asarray(rowsel), "colsel": jnp.asarray(colsel),
        "masks": jnp.asarray(masks),
        "w1t": jnp.asarray(w1t, bf), "b1": jnp.asarray(b1p),
        "w3t": jnp.asarray(w3t, bf), "b3": jnp.asarray(b3p),
    }


# -----------------------------------------------------------------------------
# Conv-stack Pallas kernel (per_step = 1 or 2 images per grid step).
# -----------------------------------------------------------------------------
def _make_conv_kernel(per_step, roll_sign):
    f32 = jnp.float32
    bf16 = jnp.bfloat16

    def kernel(b1m_ref, bias1_ref, b2m_ref, bias2_ref, bs2_ref, biases2_ref,
               rowsel_ref, colsel_ref, masks_ref, x_ref, out_ref):

        def jroll(v, shift, axis):
            return pltpu.roll(v, (roll_sign * shift) % v.shape[axis], axis=axis)

        def hshift(p, s, seg):
            # out[..., j] = p[..., j - s]; zero outside each seg-wide image.
            if s == 0:
                return p
            rolled = jroll(p, s, 1)
            if seg == H0:
                row = (s - 1) if s > 0 else (2 - s)
            else:
                row = 6 if s > 0 else 7
            return rolled * masks_ref[row:row + 1, :]

        def conv_banded(band_b16, tap, bias, k, pad, seg):
            acc = None
            for kw in range(k):
                p = jnp.dot(tap(kw), band_b16, preferred_element_type=f32)
                p = hshift(p, pad - kw, seg)
                acc = p if acc is None else acc + p
            return acc + bias

        # ---------------- stage 1: per image, 128x128, 128 lanes ---------------
        s2 = None
        for b in range(per_step):
            band = x_ref[b] if per_step == 2 else x_ref[...]      # (384,128) f32
            # conv1 (7x7, 3->2) + ReLU  -- 7 banded matmuls on the MXU.
            c1 = jnp.maximum(
                conv_banded(band.astype(bf16), lambda kw: b1m_ref[kw],
                            bias1_ref[...], 7, 3, H0), 0.0)       # (256,128)
            # conv2 (3x3, 2->2) + ReLU + skip (input channels 0,1).
            v = jnp.maximum(
                conv_banded(c1.astype(bf16), lambda kw: b2m_ref[kw],
                            bias2_ref[...], 3, 1, H0), 0.0)
            v = v + band[0:2 * H0, :]                             # f32 skip
            # fused 2x2 max pool + lane packing (f32 selection matmuls).
            m = jnp.maximum(v, jroll(v, -1, 0))
            m = jnp.maximum(m, jroll(m, -1, 1))
            pooled = jnp.dot(rowsel_ref[...], m, preferred_element_type=f32,
                             precision=lax.Precision.HIGHEST)     # (128,128)
            pooled = jnp.dot(pooled, colsel_ref[b], preferred_element_type=f32,
                             precision=lax.Precision.HIGHEST)
            s2 = pooled if s2 is None else s2 + pooled

        # ---------------- stage 2: conv3..conv14, channel-stacked, packed ------
        def conv_s2(x, l):
            y = conv_banded(x.astype(bf16), lambda kw: bs2_ref[l, kw],
                            biases2_ref[l], 3, 1, HP)
            return jnp.maximum(y, 0.0)

        x = s2                                   # (128,128): ch0 rows 0..63, ch1 rows 64..127
        for blk in range(5):                     # conv3..conv12 residual blocks
            t = conv_s2(x, 2 * blk)
            x = conv_s2(t, 2 * blk + 1) + x
        t = conv_s2(x, 10)                       # conv13 + ReLU
        y = conv_s2(t, 11)                       # conv14 (2->1): rows [0,64) valid
        out_ref[...] = y[0:HP, :] + 0.3 * x[0:HP, :]

    return kernel


def _resident_spec(arr):
    nd = arr.ndim
    return pl.BlockSpec(arr.shape, lambda i: (0,) * nd)


def _conv_stack_pallas(x_pooled, P):
    n = x_pooled.shape[0]
    # One image/step when the batch is tiny (keeps grid >= 2 so both v7x TCs
    # are used at batch 2); two lane-packed images/step for larger batches.
    per_step = 2 if n >= 4 else 1
    if per_step == 2 and n % 2:
        x_pooled = jnp.concatenate(
            [x_pooled, jnp.zeros((1,) + x_pooled.shape[1:], x_pooled.dtype)], axis=0)
    m = x_pooled.shape[0]
    g = m // per_step

    if per_step == 2:
        xg = x_pooled.reshape(g, 2, 3 * H0, H0)   # channels stacked along rows
        x_spec = pl.BlockSpec((None, 2, 3 * H0, H0), lambda i: (i, 0, 0, 0))
    else:
        xg = x_pooled.reshape(g, 3 * H0, H0)
        x_spec = pl.BlockSpec((None, 3 * H0, H0), lambda i: (i, 0, 0))

    consts = [P["b1m"], P["bias1"], P["b2m"], P["bias2"], P["bs2"], P["biases2"],
              P["rowsel"], P["colsel"], P["masks"]]
    in_specs = [_resident_spec(c) for c in consts] + [x_spec]

    kernel = _make_conv_kernel(per_step, P["roll_sign"])
    out = pl.pallas_call(
        kernel,
        out_shape=jax.ShapeDtypeStruct((g, HP, 2 * HP), jnp.float32),
        grid_spec=pltpu.PrefetchScalarGridSpec(
            num_scalar_prefetch=0,
            grid=(g,),
            in_specs=in_specs,
            out_specs=pl.BlockSpec((None, HP, 2 * HP), lambda i: (i, 0, 0)),
        ),
        compiler_params=pltpu.CompilerParams(dimension_semantics=("parallel",)),
    )(*consts, xg)

    if per_step == 2:
        # lanes [0,64) = even image, [64,128) = odd image.
        y = out.reshape(g, HP, 2, HP).transpose(0, 2, 1, 3).reshape(2 * g, 1, HP, HP)
    else:
        y = out[:, :, :HP].reshape(g, 1, HP, HP)
    return y[:n]


# -----------------------------------------------------------------------------
# Fully-connected branch (fc1 -> relu -> fc3 -> relu -> +0.3*x) as one kernel.
# -----------------------------------------------------------------------------
def _fc_kernel(x_ref, w1_ref, b1_ref, w3_ref, b3_ref, o_ref):
    x = x_ref[...]                                                # (N, 4096) f32
    xb = x.astype(jnp.bfloat16)
    h = jnp.maximum(
        jnp.dot(xb, w1_ref[...], preferred_element_type=jnp.float32) + b1_ref[...], 0.0)
    y = jnp.maximum(
        jnp.dot(h.astype(jnp.bfloat16), w3_ref[...],
                preferred_element_type=jnp.float32) + b3_ref[...], 0.0)
    o_ref[...] = y + 0.3 * x                                      # skip in f32


def _fc_pallas(x_flat, P):
    n = x_flat.shape[0]
    return pl.pallas_call(
        _fc_kernel,
        out_shape=jax.ShapeDtypeStruct((n, HP * HP), jnp.float32),
    )(x_flat, P["w1t"], P["b1"], P["w3t"], P["b3"])


# -----------------------------------------------------------------------------
# Full forward (plain-JAX glue + Pallas kernels).
# -----------------------------------------------------------------------------
def adaptive_avg_pool_128(x):
    # TODO(synk): general AdaptiveAvgPool2d (uneven bins) is not implemented; this
    # handles H % 128 == 0 and W % 128 == 0 (true for the inputs used here).
    n, c, h, w = x.shape
    assert h % 128 == 0 and w % 128 == 0
    x = x.reshape(n, c, 128, h // 128, 128, w // 128)
    return x.mean(axis=(3, 5))


def cnn_detector_forward(x, params, fully_connected=False):
    xp = adaptive_avg_pool_128(x.astype(jnp.float32))
    y = _conv_stack_pallas(xp, params)
    if fully_connected:
        xf = y.reshape(-1, HP * HP)
        yf = _fc_pallas(xf, params)
        y = yf.reshape(-1, HP, HP)[:, None, :, :]
    return y


# -----------------------------------------------------------------------------
# Pure-JAX f32 reference (for verification).
# -----------------------------------------------------------------------------
def _conv_ref(x, w, b, pad):
    y = lax.conv_general_dilated(x, w, (1, 1), [(pad, pad), (pad, pad)],
                                 dimension_numbers=("NCHW", "OIHW", "NCHW"),
                                 precision=lax.Precision.HIGHEST)
    return y + b.reshape(1, -1, 1, 1)


def forward_reference(x, conv_params, fc1, fc3, fully_connected=False):
    relu = lambda t: jnp.maximum(t, 0.0)
    x = adaptive_avg_pool_128(x.astype(jnp.float32))
    x1 = jnp.tile(x, (1, 3, 1, 1))[:, :MID]
    x = relu(_conv_ref(x, *conv_params[0], 3))
    x = relu(_conv_ref(x, *conv_params[1], 1)) + x1
    x = lax.reduce_window(x, -jnp.inf, lax.max, (1, 1, 2, 2), (1, 1, 2, 2), "VALID")
    for blk in range(5):
        x1 = x
        x = relu(_conv_ref(x, *conv_params[2 + 2 * blk], 1))
        x = relu(_conv_ref(x, *conv_params[3 + 2 * blk], 1)) + x1
    x1 = x
    x = relu(_conv_ref(x, *conv_params[12], 1))
    x = relu(_conv_ref(x, *conv_params[13], 1)) + x1[:, :1] * 0.3
    if fully_connected:
        xf = x.reshape(-1, HP * HP)
        h = relu(xf @ fc1[0].T + fc1[1])
        y = relu(h @ fc3[0].T + fc3[1])
        x = (y + 0.3 * xf).reshape(-1, HP, HP)[:, None, :, :]
    return x


if __name__ == "__main__":
    key = jax.random.PRNGKey(0)
    k_x, k_x4, k_p = jax.random.split(key, 3)
    conv_params, fc1, fc3 = init_params(k_p)
    params = prepare_params(conv_params, fc1, fc3)     # one-time precompute

    # bf16-fed MXU inference vs the f32 reference -> relaxed tolerance.
    TOL = dict(atol=5e-2, rtol=5e-2)

    # Batch 2: one image per grid step (grid=2, both v7x TCs used).
    x2 = jax.random.uniform(k_x, (2, 3, 128, 128), jnp.float32)   # NCHW, like PyTorch
    out2 = jax.block_until_ready(cnn_detector_forward(x2, params))
    assert out2.shape == (2, 1, HP, HP) and out2.dtype == jnp.float32
    ref2 = forward_reference(x2, conv_params, fc1, fc3)
    np.testing.assert_allclose(np.asarray(out2), np.asarray(ref2), **TOL)

    # Batch 4: two lane-packed images per grid step (grid=2).
    x4 = jax.random.uniform(k_x4, (4, 3, 128, 128), jnp.float32)
    out4 = jax.block_until_ready(cnn_detector_forward(x4, params))
    assert out4.shape == (4, 1, HP, HP)
    ref4 = forward_reference(x4, conv_params, fc1, fc3)
    np.testing.assert_allclose(np.asarray(out4), np.asarray(ref4), **TOL)

    # Fully-connected branch.
    out_fc = jax.block_until_ready(
        cnn_detector_forward(x2, params, fully_connected=True))
    assert out_fc.shape == (2, 1, HP, HP)
    ref_fc = forward_reference(x2, conv_params, fc1, fc3, fully_connected=True)
    np.testing.assert_allclose(np.asarray(out_fc), np.asarray(ref_fc), **TOL)

    print("KERNEL_OK")
</pallas_src>

<mosaic_0001>
module attributes {stable_mosaic.version = 11 : i64} {
  func.func @_roll_probe_kernel(%arg0: memref<8x128xf32, #tpu.memory_space<vmem>>, %arg1: memref<8x128xf32, #tpu.memory_space<vmem>>) attributes {dimension_semantics = [], scalar_prefetch = 0 : i64, scratch_operands = 0 : i64, tpu.core_type = #tpu.core_type<tc>} {
    %c0 = arith.constant 0 : index
    %c0_0 = arith.constant 0 : index
    %0 = vector.load %arg0[%c0, %c0_0] : memref<8x128xf32, #tpu.memory_space<vmem>>, vector<8x128xf32>
    %c1_i32 = arith.constant 1 : i32
    %1 = tpu.dynamic_rotate %0 by %c1_i32 dim 1 : vector<8x128xf32>, i32 -> vector<8x128xf32>
    %c0_1 = arith.constant 0 : index
    %c0_2 = arith.constant 0 : index
    %2 = vector.load %arg1[%c0_1, %c0_2] : memref<8x128xf32, #tpu.memory_space<vmem>>, vector<8x128xf32>
    tpu.vector_store %arg1[%c0_1, %c0_2], %1 {strides = array<i32>} : memref<8x128xf32, #tpu.memory_space<vmem>>, vector<8x128xf32>,
    return
  }
}

</mosaic_0001>

<bundles_post_ra>
// kernel: tpu_custom_call.1
= control target key start
LH: loop header
LB: loop body
LE: loop exit
PB: predicated region body
PF: predicated region fallthrough
CT: control target
= control target key end

     0   :  { %6 = vsyncpa [#allocation3], 0  ;;  %s118_s0 = inlined_call_operand.hbm [shape: f32[8,128], index: 0, kind: input, shape index: {}]   ;;  %s119_s1 = inlined_call_operand.hbm [shape: f32[8,128], index: 1, kind: output, shape index: {}]  }
   0x1   :  { %7 = vsyncpa [#allocation4], 0  ;;  %s13_s8 = sshll.u32 %s118_s0, 4  ;;  %s99_s9 = smov [#allocation2]   ;;  %s14_s8 = int_to_ptr.hbm [resolvable:$true] %s13_s8 }
   0x2   :  { %s15_s10 = sshll.u32 %s99_s9, 4  ;;  %s16_s10 = int_to_ptr.vmem [resolvable:$true] %s15_s10 }
   0x3   :  { %18 = dma.hbm_to_vmem [thread:$0]  %s14_s8, 128, %s16_s10, [#allocation3]  }
   0x4   :  { %95 = dma.done.wait [#allocation3], 128  }
   0x5   :  { %96 = vsyncadd [#allocation3], 4294967168  ;;  %v23_v0 = vld [vmem:[#allocation2] sm:$0xff]  ;;  %s100_s11 = smov 1   ;;  %s101_s12 = smov [#allocation5]  }
   0x6   :  { %24 = vrot.lane.b32.xlu0 %v23_v0, %s100_s11  ;;  %s32_s13 = sshll.u32 %s101_s12, 4  ;;  %s34_s16 = sshll.u32 %s119_s1, 4  ;;  %s33_s13 = int_to_ptr.vmem [resolvable:$true] %s32_s13  ;;  %s35_s16 = int_to_ptr.hbm [resolvable:$true] %s34_s16 }
  0x78   :  { %v25_v1 = vpop.permute.xlu0 %24 }
  0x79   :  { %26 = vst [vmem:[#allocation5] sm:$0xff] %v25_v1 }
  0x7a   :  { %37 = dma.vmem_to_hbm [thread:$0]  %s33_s13, 128, %s35_s16, [#allocation4]  }
  0x7b   :  { %97 = dma.done.wait [#allocation4], 128  }
  0x7c   :  { %98 = vsyncadd [#allocation4], 4294967168 }
  0x7d   :  { %42 = vsyncpa [#allocation3], 1 }
  0x7e   :  { %43 = vsyncpa [#allocation4], 1 }

</bundles_post_ra>
